<compile_context>
chip_gen: v7x
topology: tpu7x:2x2x1
jax: 0.10.0
libtpu: 0.0.40
codegen_flags: <defaults>
</compile_context>

<pallas_src>
import functools

import numpy as np

import jax
import jax.numpy as jnp
from jax.experimental import pallas as pl
from jax.experimental.pallas import tpu as pltpu


def _cdiv(a, b):
    return -(-a // b)


def _padded_vmem_bytes(shape, dtype):
    """VMEM bytes of a buffer after Mosaic (sublane, 128-lane) tile padding."""
    itemsize = jnp.dtype(dtype).itemsize
    sublane = 8 * max(1, 4 // itemsize)          # 8 rows f32, 16 rows bf16
    shape = tuple(int(d) for d in shape)
    if len(shape) < 2:
        shape = (1,) * (2 - len(shape)) + shape
    lead = 1
    for d in shape[:-2]:
        lead *= d
    rows = _cdiv(shape[-2], sublane) * sublane
    cols = _cdiv(shape[-1], 128) * 128
    return lead * rows * cols * itemsize


def _conv_rows_kernel(x_ref, w_ref, b_ref, o_ref, *, kh, ph):
    """One grid step: TB depth-slices of the 2D conv as a single banded matmul.

    x_ref : (TB, H, W*Cin)           bf16 input slices, channels folded into lanes
    w_ref : (KH*W*Cin, W_out*Cout)   bf16 block-Toeplitz weights (resident)
    b_ref : (1, W_out*Cout)          f32 bias tiled across W_out
    o_ref : (TB, H_out, W_out*Cout)  f32 lane-dense output slab
    """
    tb, H, WC = x_ref.shape
    H_out = o_ref.shape[1]

    x = x_ref[...]

    # Banded-matmul LHS: output row y consumes padded-H rows y .. y+KH-1 of the
    # slice, concatenated along lanes -> (TB, H_out, KH*W*Cin).  The
    # H-direction zero padding is built here from in-register zeros; the
    # W-direction padding and the KW taps live in the Toeplitz weight, so no
    # halo scratch is needed.
    pieces = []
    for ky in range(kh):                 # tiny static unroll (KH, typically 3)
        lo = ky - ph
        top = max(0, -lo)
        src_start = max(0, lo)
        src_stop = min(H, H_out + lo)
        bottom = H_out - top - (src_stop - src_start)
        part = []
        if top:
            part.append(jnp.zeros((tb, top, WC), x.dtype))
        part.append(x[:, src_start:src_stop, :])
        if bottom:
            part.append(jnp.zeros((tb, bottom, WC), x.dtype))
        pieces.append(part[0] if len(part) == 1
                      else jnp.concatenate(part, axis=1))
    lhs = pieces[0] if len(pieces) == 1 else jnp.concatenate(pieces, axis=-1)

    # Single fused MXU contraction for all TB slices and all KH*KW taps,
    # f32 accumulation; bias added onto the f32 accumulator.
    acc = jnp.einsum('bhk,kn->bhn', lhs, w_ref[...],
                     preferred_element_type=jnp.float32)
    acc = acc + jnp.broadcast_to(b_ref[...], acc.shape)

    # Lane-dense store: last dim is W_out*Cout (= 128 for the reference
    # shapes), so this is an unmasked vst, not an 8/128-lane masked store.
    o_ref[...] = acc.astype(o_ref.dtype)


def _pick_block_batch(B, per_slice_bytes, fixed_bytes, budget_bytes):
    """Largest divisor of B that fits the (padding-aware) VMEM budget.

    Prefers an even number of grid steps (>= 2) so the "parallel" batch axis
    splits evenly across v7x's two TensorCores; single-core v5e/v6e only pay
    ~0.35us per extra step for that.  If no even split fits (e.g. odd B),
    falls back to the largest fitting divisor (possibly a single step).
    """
    def fits(t):
        return fixed_bytes + t * per_slice_bytes <= budget_bytes
    divisors = [t for t in range(1, B + 1) if B % t == 0]
    even = [t for t in divisors if (B // t) % 2 == 0 and fits(t)]
    if even:
        return max(even)
    fitting = [t for t in divisors if fits(t)]
    return max(fitting) if fitting else 1


def conv2d_pallas(x_bhwc, weight, bias, padding):
    """x_bhwc: (B, H, W, Cin); weight: (KH, KW, Cin, Cout); bias: (Cout,).

    Stride = dilation = 1 (the AdaptiveConv3d ks[0] == 1 fast path) with
    explicit zero padding.  Returns (B, H_out, W_out, Cout) float32.
    """
    B, H, W, Cin = x_bhwc.shape
    KH, KW, _, Cout = weight.shape
    ph, pw = padding
    H_out = H + 2 * ph - KH + 1
    W_out = W + 2 * pw - KW + 1
    WC = W * Cin
    K = KH * WC
    N = W_out * Cout

    # Channels folded into lanes: (B, H, W*Cin), bf16 for the MXU.
    x = x_bhwc.astype(jnp.bfloat16).reshape(B, H, WC)

    # Block-Toeplitz weight: entry [ky*W*Cin + p*Cin + ci, x*Cout + co] is
    # weight[ky, kx, ci, co] with kx = p - x + pw (zero if kx is out of range,
    # which also implements the W-direction zero padding).  This folds all
    # KH*KW taps into one matmul whose output is already lane-dense.
    sel = (np.arange(W)[None, :, None]
           == (np.arange(W_out)[None, None, :]
               + np.arange(KW)[:, None, None] - pw)).astype(np.float32)
    w_t = jnp.einsum('kpx,ykio->ypixo', jnp.asarray(sel),
                     weight.astype(jnp.float32))
    w_t = w_t.reshape(K, N).astype(jnp.bfloat16)

    # Bias replicated across W_out so it adds directly onto the lane-dense
    # output rows (f32, added to the f32 accumulator).
    b_row = jnp.tile(bias.astype(jnp.float32), W_out).reshape(1, N)

    # Padding-aware VMEM accounting (lanes pad to 128, sublanes to 8/16), so
    # the block choice also holds on v7x's 64 MiB VMEM.
    per_slice = (2 * _padded_vmem_bytes((1, H, WC), jnp.bfloat16)      # in, 2 bufs
                 + 2 * _padded_vmem_bytes((1, H_out, N), jnp.float32)  # out, 2 bufs
                 + _padded_vmem_bytes((1, H_out, K), jnp.bfloat16)     # live lhs
                 + _padded_vmem_bytes((1, H_out, N), jnp.float32))     # live acc
    fixed = (2 * _padded_vmem_bytes((K, N), jnp.bfloat16)
             + 2 * _padded_vmem_bytes((1, N), jnp.float32))
    tb = _pick_block_batch(B, per_slice, fixed,
                           budget_bytes=12 * 1024 * 1024)
    grid = (B // tb,)

    flops = 2 * B * H_out * K * N            # matmul FLOPs actually issued
    bytes_accessed = (x.size * 2 + w_t.size * 2 + b_row.size * 4
                      + B * H_out * N * 4)

    kernel = functools.partial(_conv_rows_kernel, kh=KH, ph=ph)
    out = pl.pallas_call(
        kernel,
        # Output stays f32 to match the PyTorch module's dtype; switch to
        # bf16 here (cast at store) to halve writeback if acceptable.
        out_shape=jax.ShapeDtypeStruct((B, H_out, N), jnp.float32),
        grid_spec=pltpu.PrefetchScalarGridSpec(
            num_scalar_prefetch=0,
            grid=grid,
            in_specs=[
                pl.BlockSpec((tb, H, WC), lambda i: (i, 0, 0)),
                pl.BlockSpec((K, N), lambda i: (0, 0)),
                pl.BlockSpec((1, N), lambda i: (0, 0)),
            ],
            out_specs=pl.BlockSpec((tb, H_out, N), lambda i: (i, 0, 0)),
        ),
        compiler_params=pltpu.CompilerParams(
            dimension_semantics=("parallel",),
            vmem_limit_bytes=32 * 1024 * 1024),
        cost_estimate=pl.CostEstimate(
            flops=flops, transcendentals=0, bytes_accessed=bytes_accessed),
    )(x, w_t, b_row)

    # Free, contiguous reshape back to (B, H_out, W_out, Cout).
    return out.reshape(B, H_out, W_out, Cout)


class AdaptiveConv3d:
    """JAX/Pallas port of elektronn3's AdaptiveConv3d (ks[0] == 1 fast path)."""

    def __init__(self, in_channels, out_channels, *, kernel_size,
                 stride=(0, 1, 1), padding=(0, 0, 0), dilation=(1, 1, 1),
                 key=None):
        assert isinstance(kernel_size, tuple)
        if kernel_size[0] == 1:
            self.kernel_size = kernel_size[1:]
            self.stride = stride[1:]
            self.padding = padding[1:]
            self.dilation = dilation[1:]
            assert self.stride == (1, 1) and self.dilation == (1, 1), \
                "only stride/dilation 1 supported in this Pallas port"
        else:
            # TODO(synk): the full 3D (kernel_size[0] > 1) path is not lowered
            # to Pallas; the module exists specifically for the kd == 1 case.
            raise NotImplementedError(
                "only the kernel_size[0] == 1 path is implemented")

        self.in_channels = in_channels
        self.out_channels = out_channels
        kh, kw = self.kernel_size

        # Deterministic init mimicking PyTorch Conv2d default (uniform with
        # bound = 1/sqrt(fan_in)).
        if key is None:
            key = jax.random.PRNGKey(0)
        kw_key, kb_key = jax.random.split(key)
        fan_in = in_channels * kh * kw
        bound = 1.0 / float(fan_in) ** 0.5
        self.weight = jax.random.uniform(
            kw_key, (kh, kw, in_channels, out_channels),
            dtype=jnp.float32, minval=-bound, maxval=bound)
        self.bias = jax.random.uniform(
            kb_key, (out_channels,), dtype=jnp.float32,
            minval=-bound, maxval=bound)

    def __call__(self, x):
        # x: (N, Cin, D, H, W)  -- PyTorch NCDHW convention
        n, c, d, h, w = x.shape
        # NCDHW -> (N*D, H, W, Cin): the only wrapper-side pass over x.
        x_bhwc = jnp.transpose(x, (0, 2, 3, 4, 1)).reshape(n * d, h, w, c)
        out_bhwc = conv2d_pallas(x_bhwc, self.weight, self.bias, self.padding)
        ho, wo = out_bhwc.shape[1], out_bhwc.shape[2]
        out = out_bhwc.reshape(n, d, ho, wo, self.out_channels)
        # back to (N, Cout, D, H_out, W_out)
        return jnp.transpose(out, (0, 4, 1, 2, 3))


def _reference_forward(x, weight_khwcio, bias, padding):
    """Pure-JAX reference for the PyTorch forward2d semantics, using the same
    bf16 input/weight rounding as the kernel (f32 accumulation)."""
    n, c, d, h, w = x.shape
    view2d = jnp.transpose(x, (0, 2, 1, 3, 4)).reshape(n * d, c, h, w)
    view2d = view2d.astype(jnp.bfloat16)
    # weight (KH, KW, Cin, Cout) -> OIHW
    w_oihw = jnp.transpose(weight_khwcio, (3, 2, 0, 1)).astype(jnp.bfloat16)
    ph, pw = padding
    out2d = jax.lax.conv_general_dilated(
        view2d, w_oihw, window_strides=(1, 1),
        padding=[(ph, ph), (pw, pw)],
        dimension_numbers=("NCHW", "OIHW", "NCHW"),
        preferred_element_type=jnp.float32)
    out2d = out2d + bias.reshape(1, -1, 1, 1)
    ho, wo = out2d.shape[-2:]
    co = out2d.shape[1]
    out3d = out2d.reshape(n, d, co, ho, wo)
    return jnp.transpose(out3d, (0, 2, 1, 3, 4))


if __name__ == "__main__":
    key = jax.random.PRNGKey(0)
    xkey, pkey = jax.random.split(key)

    N, Cin, D, H, W = 2, 4, 8, 16, 16
    Cout = 8

    x = jax.random.normal(xkey, (N, Cin, D, H, W), dtype=jnp.float32)

    mod = AdaptiveConv3d(Cin, Cout, kernel_size=(1, 3, 3),
                         padding=(0, 1, 1), key=pkey)

    fwd = jax.jit(mod.__call__)
    out = jax.block_until_ready(fwd(x))

    ref = _reference_forward(x, mod.weight, mod.bias, mod.padding)
    assert out.shape == (N, Cout, D, H, W), out.shape
    max_err = float(jnp.max(jnp.abs(out - ref)))
    assert jnp.allclose(out, ref, atol=1e-2, rtol=1e-2), max_err

    print("KERNEL_OK")
</pallas_src>

<mosaic_0001>
module attributes {stable_mosaic.version = 11 : i64} {
  func.func @_conv_rows_kernel(%arg0: i32, %arg1: memref<8x16x64xbf16, #tpu.memory_space<vmem>>, %arg2: memref<192x128xbf16, #tpu.memory_space<vmem>>, %arg3: memref<1x128xf32, #tpu.memory_space<vmem>>, %arg4: memref<8x16x128xf32, #tpu.memory_space<vmem>>) attributes {dimension_semantics = [#tpu.dimension_semantics<parallel>], iteration_bounds = array<i64: 2>, scalar_prefetch = 0 : i64, scratch_operands = 0 : i64, tpu.core_type = #tpu.core_type<tc>, window_params = [{transform_indices = @transform_0, window_bounds = array<i64: 8, 16, 64>}, {pipeline_mode = #tpu.pipeline_mode<synchronous>, transform_indices = @transform_1, window_bounds = array<i64: 192, 128>}, {pipeline_mode = #tpu.pipeline_mode<synchronous>, transform_indices = @transform_2, window_bounds = array<i64: 1, 128>}, {transform_indices = @transform_3, window_bounds = array<i64: 8, 16, 128>}]} {
    %c0 = arith.constant 0 : index
    %c0_0 = arith.constant 0 : index
    %c0_1 = arith.constant 0 : index
    %0 = vector.load %arg1[%c0, %c0_0, %c0_1] : memref<8x16x64xbf16, #tpu.memory_space<vmem>>, vector<8x16x64xbf16>
    %cst = arith.constant 0.000000e+00 : bf16
    %1 = vector.broadcast %cst : bf16 to vector<8x1x64xbf16>
    %2 = vector.extract_strided_slice %0 {offsets = [0, 0, 0], sizes = [8, 15, 64], strides = [1, 1, 1]} : vector<8x16x64xbf16> to vector<8x15x64xbf16>
    %3 = tpu.concatenate %1, %2 in 1 : vector<8x1x64xbf16>, vector<8x15x64xbf16> -> vector<8x16x64xbf16>
    %4 = vector.extract_strided_slice %0 {offsets = [0, 1, 0], sizes = [8, 15, 64], strides = [1, 1, 1]} : vector<8x16x64xbf16> to vector<8x15x64xbf16>
    %cst_2 = arith.constant 0.000000e+00 : bf16
    %5 = vector.broadcast %cst_2 : bf16 to vector<8x1x64xbf16>
    %6 = tpu.concatenate %4, %5 in 1 : vector<8x15x64xbf16>, vector<8x1x64xbf16> -> vector<8x16x64xbf16>
    %7 = tpu.concatenate %3, %0, %6 in 2 : vector<8x16x64xbf16>, vector<8x16x64xbf16>, vector<8x16x64xbf16> -> vector<8x16x192xbf16>
    %c0_3 = arith.constant 0 : index
    %c0_4 = arith.constant 0 : index
    %8 = vector.load %arg2[%c0_3, %c0_4] : memref<192x128xbf16, #tpu.memory_space<vmem>>, vector<192x128xbf16>
    "tpu.trace_start"() <{level = 10 : i32, message = "bhk,kn->bhn"}> : () -> ()
    %cst_5 = arith.constant dense<0.000000e+00> : vector<8x16x128xf32>
    %9 = tpu.matmul %7, %8, %cst_5 {dimension_numbers = #tpu.dot_dimension_numbers<[2], [0], [0, 1], [1], [0, 0, 0, 1, 1, 1], [], []>} : vector<8x16x192xbf16>, vector<192x128xbf16>, vector<8x16x128xf32> -> vector<8x16x128xf32>
    "tpu.trace_stop"() : () -> ()
    %c0_6 = arith.constant 0 : index
    %c0_7 = arith.constant 0 : index
    %10 = vector.load %arg3[%c0_6, %c0_7] : memref<1x128xf32, #tpu.memory_space<vmem>>, vector<1x128xf32>
    %11 = vector.shape_cast %10 : vector<1x128xf32> to vector<1x1x128xf32>
    %12 = vector.broadcast %11 : vector<1x1x128xf32> to vector<8x16x128xf32>
    %13 = arith.addf %9, %12 : vector<8x16x128xf32>
    %c0_8 = arith.constant 0 : index
    %c0_9 = arith.constant 0 : index
    %c0_10 = arith.constant 0 : index
    %14 = vector.load %arg4[%c0_8, %c0_9, %c0_10] : memref<8x16x128xf32, #tpu.memory_space<vmem>>, vector<8x16x128xf32>
    tpu.vector_store %arg4[%c0_8, %c0_9, %c0_10], %13 {strides = array<i32>} : memref<8x16x128xf32, #tpu.memory_space<vmem>>, vector<8x16x128xf32>,
    return
  }
  func.func @transform_0(%arg0: i32) -> (i32, i32, i32) {
    %c0_i32 = arith.constant 0 : i32
    %c0_i32_0 = arith.constant 0 : i32
    %c0_i32_1 = arith.constant 0 : i32
    return %arg0, %c0_i32, %c0_i32_0 : i32, i32, i32
  }
  func.func @transform_1(%arg0: i32) -> (i32, i32) {
    %c0_i32 = arith.constant 0 : i32
    %c0_i32_0 = arith.constant 0 : i32
    %c0_i32_1 = arith.constant 0 : i32
    return %c0_i32, %c0_i32_0 : i32, i32
  }
  func.func @transform_2(%arg0: i32) -> (i32, i32) {
    %c0_i32 = arith.constant 0 : i32
    %c0_i32_0 = arith.constant 0 : i32
    %c0_i32_1 = arith.constant 0 : i32
    return %c0_i32, %c0_i32_0 : i32, i32
  }
  func.func @transform_3(%arg0: i32) -> (i32, i32, i32) {
    %c0_i32 = arith.constant 0 : i32
    %c0_i32_0 = arith.constant 0 : i32
    %c0_i32_1 = arith.constant 0 : i32
    return %arg0, %c0_i32, %c0_i32_0 : i32, i32, i32
  }
}

</mosaic_0001>

<bundles_post_ra>
// kernel: tile.6
= control target key start
LH: loop header
LB: loop body
LE: loop exit
PB: predicated region body
PF: predicated region fallthrough
CT: control target
= control target key end

     0   :  { %s28_s0 = inlined_call_operand.vmem [shape: f32[8], index: 0, kind: input, shape index: {}]   ;;  %s29_s1 = inlined_call_operand.vmem [shape: f32[16,8], index: 1, kind: output, shape index: {}]  }
   0x1   :  { %v4_v0 = vld [vmem:[%s28_s0] ss:$0 sm:$0xff] }
   0x2   :  { %5 = vst [vmem:[%s29_s1] sm:$0xff] %v4_v0  ;;  %8 = vst [vmem:[%s29_s1 + $0x8] sm:$0xff] %v4_v0 }

// kernel: tile.7
= control target key start
LH: loop header
LB: loop body
LE: loop exit
PB: predicated region body
PF: predicated region fallthrough
CT: control target
= control target key end

     0   :  { %s131_s10 = smov 120   ;;  %s132_s11 = smov 104   ;;  %vm3_vm0 = vcmask 64512   ;;  %vm9_vm1 = vcmask 1048512   ;;  %vm15_vm2 = vcmask 982912   ;;  %vm21_vm3 = vcmask 917312   ;;  %s207_s0 = inlined_call_operand.vmem [shape: f32[16,8], index: 0, kind: input, shape index: {}]   ;;  %s208_s1 = inlined_call_operand.vmem [shape: f32[1,128], index: 1, kind: output, shape index: {}]  }
   0x1   :  { %v101_v0 = vld [vmem:[%s207_s0 + $0xf] sm:$0x1]   ;;  %v103_v1 = vld [vmem:[%s207_s0 + $0xd] sm:$0x1]   ;;  %v102_v2 = vld [vmem:[%s207_s0 + $0xe] sm:$0x1]  }
   0x2   :  { %7 = vrot.lane.b32.xlu0 %v101_v0, %s131_s10  ;;  %19 = vrot.lane.b32.xlu1 %v103_v1, %s132_s11  ;;  %v104_v3 = vld [vmem:[%s207_s0 + $0xc] sm:$0x1]   ;;  %s133_s16 = smov 112   ;;  %s134_s17 = smov 96   ;;  %v105_v4 = vld [vmem:[%s207_s0 + $0xb] sm:$0x1]  }
   0x3   :  { %v106_v5 = vld [vmem:[%s207_s0 + $0xa] sm:$0x1]   ;;  %v2_v6 = vld [vmem:[%s207_s0] sm:$0x1]   ;;  %s135_s24 = smov 88   ;;  %s136_s25 = smov 80  }
   0x4   :  { %4 = vst.msk [vmem:[#allocation0] sm:$0x1] %vm3_vm0, %v2_v6   ;;  %v107_v7 = vld [vmem:[%s207_s0 + $0x9] sm:$0x1]   ;;  %v108_v8 = vld [vmem:[%s207_s0 + $0x8] sm:$0x1]  }
   0x5   :  { %s137_s30 = smov 72   ;;  %s138_s2 = smov 64   ;;  %v109_v9 = vld [vmem:[%s207_s0 + $0x7] sm:$0x1]   ;;  %v110_v10 = vld [vmem:[%s207_s0 + $0x6] sm:$0x1]  }
   0x6   :  { %13 = vrot.lane.b32.xlu0 %v102_v2, %s133_s16  ;;  %25 = vrot.lane.b32.xlu1 %v104_v3, %s134_s17  ;;  %s139_s7 = smov 56   ;;  %s140_s8 = smov 48   ;;  %v111_v11 = vld [vmem:[%s207_s0 + $0x5] sm:$0x1]   ;;  %v112_v12 = vld [vmem:[%s207_s0 + $0x4] sm:$0x1]  }
   0x7   :  { %s141_s13 = smov 40   ;;  %s142_s14 = smov 32   ;;  %v113_v13 = vld [vmem:[%s207_s0 + $0x3] sm:$0x1]   ;;  %v114_v14 = vld [vmem:[%s207_s0 + $0x2] sm:$0x1]  }
   0x8   :  { %s143_s19 = smov 24   ;;  %s144_s20 = smov 16   ;;  %v115_v15 = vld [vmem:[%s207_s0 + $0x1] sm:$0x1]   ;;  %vm27_vm4 = vcmask 851712   ;;  %vm33_vm5 = vcmask 786112  }
   0x9   :  { %s145_s0 = smov 8   ;;  %vm39_vm6 = vcmask 720512   ;;  %vm45_vm7 = vcmask 654912   ;;  %vm51_vm8 = vcmask 589312   ;;  %vm57_vm9 = vcmask 523712  }
   0xa   :  { %31 = vrot.lane.b32.xlu0 %v105_v4, %s135_s24  ;;  %37 = vrot.lane.b32.xlu1 %v106_v5, %s136_s25  ;;  %vm63_vm10 = vcmask 458112   ;;  %vm69_vm11 = vcmask 392512   ;;  %vm75_vm12 = vcmask 326912   ;;  %vm81_vm13 = vcmask 261312  }
   0xb   :  { %vm87_vm14 = vcmask 195712   ;;  %vm93_vm15 = vcmask 130112  }
   0xe   :  { %43 = vrot.lane.b32.xlu0 %v107_v7, %s137_s30  ;;  %49 = vrot.lane.b32.xlu1 %v108_v8, %s138_s2 }
  0x12   :  { %55 = vrot.lane.b32.xlu0 %v109_v9, %s139_s7  ;;  %61 = vrot.lane.b32.xlu1 %v110_v10, %s140_s8 }
  0x16   :  { %67 = vrot.lane.b32.xlu0 %v111_v11, %s141_s13  ;;  %73 = vrot.lane.b32.xlu1 %v112_v12, %s142_s14 }
  0x1a   :  { %79 = vrot.lane.b32.xlu0 %v113_v13, %s143_s19  ;;  %85 = vrot.lane.b32.xlu1 %v114_v14, %s144_s20 }
  0x1e   :  { %91 = vrot.lane.b32.xlu0 %v115_v15, %s145_s0 }
  0x74   :  { %v8_v16 = vpop.permute.xlu0 %7   ;;  %v20_v17 = vpop.permute.xlu1 %19  }
  0x75   :  { %10 = vst.msk [vmem:[#allocation0] sm:$0x1] %vm9_vm1, %v8_v16  }
  0x78   :  { %v14_v18 = vpop.permute.xlu0 %13   ;;  %v26_v19 = vpop.permute.xlu1 %25  }
  0x79   :  { %16 = vst.msk [vmem:[#allocation0] sm:$0x1] %vm15_vm2, %v14_v18  }
  0x7a   :  { %22 = vst.msk [vmem:[#allocation0] sm:$0x1] %vm21_vm3, %v20_v17  }
  0x7b   :  { %28 = vst.msk [vmem:[#allocation0] sm:$0x1] %vm27_vm4, %v26_v19  }
  0x7c   :  { %v32_v20 = vpop.permute.xlu0 %31   ;;  %v38_v21 = vpop.permute.xlu1 %37  }
  0x7d   :  { %34 = vst.msk [vmem:[#allocation0] sm:$0x1] %vm33_vm5, %v32_v20  }
  0x7e   :  { %40 = vst.msk [vmem:[#allocation0] sm:$0x1] %vm39_vm6, %v38_v21  }
  0x80   :  { %v44_v22 = vpop.permute.xlu0 %43   ;;  %v50_v23 = vpop.permute.xlu1 %49  }
  0x81   :  { %46 = vst.msk [vmem:[#allocation0] sm:$0x1] %vm45_vm7, %v44_v22  }
  0x82   :  { %52 = vst.msk [vmem:[#allocation0] sm:$0x1] %vm51_vm8, %v50_v23  }
  0x84   :  { %v56_v24 = vpop.permute.xlu0 %55   ;;  %v62_v25 = vpop.permute.xlu1 %61  }
  0x85   :  { %58 = vst.msk [vmem:[#allocation0] sm:$0x1] %vm57_vm9, %v56_v24  }
  0x86   :  { %64 = vst.msk [vmem:[#allocation0] sm:$0x1] %vm63_vm10, %v62_v25  }
  0x88   :  { %v68_v26 = vpop.permute.xlu0 %67   ;;  %v74_v27 = vpop.permute.xlu1 %73  }
  0x89   :  { %70 = vst.msk [vmem:[#allocation0] sm:$0x1] %vm69_vm11, %v68_v26  }
  0x8a   :  { %76 = vst.msk [vmem:[#allocation0] sm:$0x1] %vm75_vm12, %v74_v27  }
  0x8c   :  { %v80_v28 = vpop.permute.xlu0 %79   ;;  %v86_v29 = vpop.permute.xlu1 %85  }
  0x8d   :  { %82 = vst.msk [vmem:[#allocation0] sm:$0x1] %vm81_vm13, %v80_v28  }
  0x8e   :  { %88 = vst.msk [vmem:[#allocation0] sm:$0x1] %vm87_vm14, %v86_v29  }
  0x90   :  { %v92_v30 = vpop.permute.xlu0 %91  }
  0x91   :  { %94 = vst.msk [vmem:[#allocation0] sm:$0x1] %vm93_vm15, %v92_v30  }
  0x98   :  { %v98_v31 = vld [vmem:[#allocation0] sm:$0x1] }
  0x99   :  { %100 = vst [vmem:[%s208_s1] sm:$0x1] %v98_v31 }

// kernel: a_call__.1
= control target key start
LH: loop header
LB: loop body
LE: loop exit
PB: predicated region body
PF: predicated region fallthrough
CT: control target
= control target key end

     0   :  { %s821_s12 = smov 0   ;;  %s1123_s0 = inlined_call_operand.vmem [shape: bf16[16,16,64], index: 0, kind: input, shape index: {}]   ;;  %s1124_s1 = inlined_call_operand.vmem [shape: bf16[192,128], index: 1, kind: input, shape index: {}]   ;;  %s1125_s2 = inlined_call_operand.vmem [shape: f32[1,128], index: 2, kind: input, shape index: {}]   ;;  %s1126_s3 = inlined_call_operand.vmem [shape: f32[16,16,128], index: 3, kind: output, shape index: {}]  }
   0x1 LB: > { %s693_s13 = sadd.s32 4294967295, %s797_s12   ;;  %p697_p0 = scmp.ge.s32.totalorder %s797_s12, 1  ;;  %s797_s12 = sphi %s821_s12, %s13_s12  }
   0x2   : > { %p139_p1 = scmp.lt.s32.totalorder %s797_s12, 3 }
   0x4   : > { %p140_p2 = pnand %p697_p0, %p139_p1 }
   0x5   : > { %s698_s14 = sshll.u32 (!%p140_p2), %s693_s13, 3  ;;  %v779_v0 = vld [vmem:[%s1124_s1] sm:$0xff] (!%p140_p2)   ;;  %v799_v1 = vmov (!%p140_p2), 0   ;;  %v780_v2 = vld [vmem:[%s1124_s1 + $0x8] sm:$0xff] (!%p140_p2)   ;;  %v781_v3 = vld [vmem:[%s1124_s1 + $0x10] sm:$0xff] (!%p140_p2)   ;;  %s800_s25 = smov (!%p140_p2), 64  }
   0x6   : > { %143 = sbr.rel (%p140_p2) target bundleno = 378 (0x17a), region = 32  ;;  %p166_p3 = scmp.lt.s32.totalorder (!%p140_p2), %s698_s14, 15  ;;  %522 = vmatprep.subr.bf16.mxu0 (!%p140_p2), %v799_v1  ;;  %737 = vmatprep.subr.bf16.mxu1 (!%p140_p2), %v799_v1  ;;  %v782_v7 = vld [vmem:[%s1124_s1 + $0x18] sm:$0xff] (!%p140_p2)   ;;  %v783_v11 = vld [vmem:[%s1124_s1 + $0x20] sm:$0xff] (!%p140_p2)   ;;  %vm335_vm0 = vcmask (!%p140_p2), 1047552   ;;  %v784_v15 = vld [vmem:[%s1124_s1 + $0x28] sm:$0xff] (!%p140_p2)  }
   0x7   : > { %523 = vmatpush1.bf16.msra.mxu0 (!%p140_p2), %v779_v0  ;;  %749 = vmatpush1.bf16.msra.mxu1 (!%p140_p2), %v779_v0  ;;  %vm336_vm1 = vsmask.f32 (!%p140_p2), 7424  ;;  %vm362_vm3 = vcmask (!%p140_p2), 523264   ;;  %v785_v30 = vld [vmem:[%s1124_s1 + $0x30] sm:$0xff] (!%p140_p2)   ;;  %v786_v45 = vld [vmem:[%s1124_s1 + $0x38] sm:$0xff] (!%p140_p2)   ;;  %v787_v55 = vld [vmem:[%s1124_s1 + $0x40] sm:$0xff] (!%p140_p2)  }
   0x8   : > { %524 = vmatprep.subr.bf16.mxu0 (!%p140_p2), %v799_v1  ;;  %738 = vmatprep.subr.bf16.mxu1 (!%p140_p2), %v799_v1  ;;  %vm910_vm2 = vmand (!%p140_p2), %vm335_vm0, %vm336_vm1  ;;  %v788_v62 = vld [vmem:[%s1124_s1 + $0x48] sm:$0xff] (!%p140_p2)   ;;  %v789_v0 = vld [vmem:[%s1124_s1 + $0x50] sm:$0xff] (!%p140_p2)   ;;  %vm300_vm4 = vcmask (!%p140_p2), 1040384   ;;  %vm301_vm5 = vsmask.f32 (!%p140_p2), 256 }
   0x9   : > { %vm1015_vm6 = vmand (!%p140_p2), %vm300_vm4, %vm301_vm5 }
   0xb   : > { %525 = vmatpush1.bf16.msra.mxu0 (!%p140_p2), %v780_v2  ;;  %750 = vmatpush1.bf16.msra.mxu1 (!%p140_p2), %v780_v2  ;;  %v790_v2 = vld [vmem:[%s1124_s1 + $0x58] sm:$0xff] (!%p140_p2)  }
   0xc   : > { %526 = vmatprep.subr.bf16.mxu0 (!%p140_p2), %v799_v1  ;;  %739 = vmatprep.subr.bf16.mxu1 (!%p140_p2), %v799_v1 }
   0xd   : > { %s1132_s14 = smov (!%p166_p3, %s698_s14), 15 }
   0xe   : > { %s735_s19 = sshll.u32 %s1132_s14, 3 }
   0xf   : > { %s845_s22 = scalar_lea.vmem %s1123_s0, %s735_s19  ;;  %527 = vmatpush1.bf16.msra.mxu0 %v781_v3  ;;  %751 = vmatpush1.bf16.msra.mxu1 %v781_v3  ;;  %s736_s19 = sshll.u32 %s1132_s14, 4 }
  0x10   : > { %v771_v4 = vld [vmem:[%s845_s22] sm:$0xff]   ;;  %v858_v6 = vld [vmem:[%s845_s22 + $0x8] sm:$0xff]   ;;  %528 = vmatprep.subr.bf16.mxu0 %v799_v1  ;;  %740 = vmatprep.subr.bf16.mxu1 %v799_v1  ;;  %v873_v9 = vld [vmem:[%s845_s22 + $0x10] sm:$0xff]   ;;  %s1086_s24 = scalar_lea.vmem %s1126_s3, %s736_s19 }
  0x11   : > { %v854_v5 = vld [vmem:[%s845_s22 + $0x20] sm:$0xff]   ;;  %346 = vrot.lane.b32.xlu0 %v771_v4, %s800_s25  ;;  %348 = vrot.lane.b32.xlu1 %v858_v6, %s800_s25  ;;  %v866_v8 = vld [vmem:[%s845_s22 + $0x28] sm:$0xff]   ;;  %v237_v10 = vshrl.u32 %v771_v4, 16  ;;  %v240_v12 = vshll.u32 %v771_v4, 16  ;;  %v247_v14 = vshll.u32 %v858_v6, 16  ;;  %v254_v23 = vshll.u32 %v873_v9, 16 }
  0x12   : > { %v881_v13 = vld [vmem:[%s845_s22 + $0x30] sm:$0xff]   ;;  %v892_v16 = vld [vmem:[%s845_s22 + $0x18] sm:$0xff]   ;;  %v275_v18 = vshll.u32 %v866_v8, 16  ;;  %v265_v22 = vshrl.u32 %v854_v5, 16  ;;  %v268_v25 = vshll.u32 %v854_v5, 16  ;;  %v244_v28 = vshrl.u32 %v858_v6, 16 }
  0x13   : > { %529 = vmatpush1.bf16.msra.mxu0 %v782_v7  ;;  %752 = vmatpush1.bf16.msra.mxu1 %v782_v7  ;;  %v239_v17 = vrot.slane %v237_v10, 7  ;;  %v311_v19 = vrot.slane %v240_v12, 1  ;;  %v898_v20 = vld [vmem:[%s845_s22 + $0x38] sm:$0xff]   ;;  %v313_v29 = vrot.slane %v247_v14, 1  ;;  %v272_v33 = vshrl.u32 %v866_v8, 16 }
  0x14   : > { %530 = vmatprep.subr.bf16.mxu0 %v799_v1  ;;  %741 = vmatprep.subr.bf16.mxu1 %v799_v1  ;;  %v267_v27 = vrot.slane %v265_v22, 7  ;;  %v319_v32 = vrot.slane %v268_v25, 1  ;;  %v321_v34 = vrot.slane %v275_v18, 1  ;;  %v282_v35 = vshll.u32 %v881_v13, 16 }
  0x15   : > { %354 = vrot.lane.b32.xlu0 %v854_v5, %s800_s25  ;;  %356 = vrot.lane.b32.xlu1 %v866_v8, %s800_s25  ;;  %v901_v21 = vor.u32 %v240_v12, %v239_v17  ;;  %v312_v24 = vor.u32 %v311_v19, %v237_v10  ;;  %v261_v36 = vshll.u32 %v892_v16, 16  ;;  %v934_v38 = vor.u32 %v313_v29, %v244_v28 }
  0x16   : > { %v930_v37 = vor.u32 %v268_v25, %v267_v27  ;;  %v320_v39 = vor.u32 %v319_v32, %v265_v22  ;;  %v940_v40 = vor.u32 %v321_v34, %v272_v33  ;;  %v251_v41 = vshrl.u32 %v873_v9, 16 }
  0x17   : > { %531 = vmatpush1.bf16.msra.mxu0 %v783_v11  ;;  %753 = vmatpush1.bf16.msra.mxu1 %v783_v11  ;;  %v338_v31 = vsel %vm910_vm2, %v312_v24, 0  ;;  %v315_v42 = vrot.slane %v254_v23, 1  ;;  %v339_v43 = vsel %vm910_vm2, %v934_v38, 0  ;;  %v289_v44 = vshll.u32 %v898_v20, 16 }
  0x18   : > { %532 = vmatprep.subr.bf16.mxu0 %v799_v1  ;;  %742 = vmatprep.subr.bf16.mxu1 %v799_v1  ;;  %v342_v46 = vsel %vm910_vm2, %v320_v39, 0  ;;  %v343_v47 = vsel %vm910_vm2, %v940_v40, 0  ;;  %v279_v49 = vshrl.u32 %v881_v13, 16  ;;  %v323_v50 = vrot.slane %v282_v35, 1 }
  0x19   : > { %350 = vrot.lane.b32.xlu0 %v873_v9, %s800_s25  ;;  %358 = vrot.lane.b32.xlu1 %v881_v13, %s800_s25  ;;  %v959_v48 = vor.u32 %v315_v42, %v251_v41  ;;  %v258_v52 = vshrl.u32 %v892_v16, 16  ;;  %v317_v53 = vrot.slane %v261_v36, 1  ;;  %v286_v57 = vshrl.u32 %v898_v20, 16 }
  0x1a   : > { %725 = vmatprep.mubr.msk.bf16.mxu0 %vm362_vm3, %v338_v31  ;;  %729 = vmatprep.mubr.msk.bf16.mxu1 %vm362_vm3, %v342_v46  ;;  %v973_v54 = vor.u32 %v323_v50, %v279_v49  ;;  %v325_v58 = vrot.slane %v289_v44, 1  ;;  %v246_v4 = vrot.slane %v244_v28, 7  ;;  %v303_v5 = vsel %vm1015_vm6, 0, %v901_v21 }
  0x1b   : > { %533 = vmatpush1.bf16.msra.mxu0 %v784_v15  ;;  %754 = vmatpush1.bf16.msra.mxu1 %v784_v15  ;;  %v340_v51 = vsel %vm910_vm2, %v959_v48, 0  ;;  %v980_v56 = vor.u32 %v317_v53, %v258_v52  ;;  %v307_v12 = vsel %vm1015_vm6, 0, %v930_v37  ;;  %v281_v28 = vrot.slane %v279_v49, 7 }
  0x1c   : > { %534 = vmatprep.subr.bf16.mxu0 %v799_v1  ;;  %743 = vmatprep.subr.bf16.mxu1 %v799_v1  ;;  %v344_v59 = vsel %vm910_vm2, %v973_v54, 0  ;;  %v995_v61 = vor.u32 %v325_v58, %v286_v57  ;;  %v249_v10 = vor.u32 %v247_v14, %v246_v4  ;;  %v253_v14 = vrot.slane %v251_v41, 7 }
  0x1d   : > { %352 = vrot.lane.b32.xlu0 %v892_v16, %s800_s25  ;;  %360 = vrot.lane.b32.xlu1 %v898_v20, %s800_s25  ;;  %v341_v60 = vsel %vm910_vm2, %v980_v56, 0  ;;  %v260_v31 = vrot.slane %v258_v52, 7  ;;  %v288_v13 = vrot.slane %v286_v57, 7  ;;  %v1081_v20 = vld [vmem:[%s1125_s2] ss:$0 sm:$0xff] }
  0x1e   : > { %v345_v63 = vsel %vm910_vm2, %v995_v61, 0  ;;  %v304_v19 = vsel %vm1015_vm6, 0, %v249_v10  ;;  %v256_v27 = vor.u32 %v254_v23, %v253_v14 }
  0x1f   : > { %535 = vmatpush1.bf16.msra.mxu0 %v785_v30  ;;  %755 = vmatpush1.bf16.msra.mxu1 %v785_v30  ;;  %v284_v30 = vor.u32 %v282_v35, %v281_v28  ;;  %v291_v38 = vor.u32 %v289_v44, %v288_v13 }
  0x20   : > { %536 = vmatprep.subr.bf16.mxu0 %v799_v1  ;;  %744 = vmatprep.subr.bf16.mxu1 %v799_v1  ;;  %v305_v29 = vsel %vm1015_vm6, 0, %v256_v27 }
  0x21   : > { %v309_v32 = vsel %vm1015_vm6, 0, %v284_v30  ;;  %v310_v39 = vsel %vm1015_vm6, 0, %v291_v38 }
  0x23   : > { %537 = vmatpush1.bf16.msra.mxu0 %v786_v45  ;;  %756 = vmatpush1.bf16.msra.mxu1 %v786_v45 }
  0x24   : > { %538 = vmatprep.subr.bf16.mxu0 %v799_v1  ;;  %745 = vmatprep.subr.bf16.mxu1 %v799_v1 }
  0x27   : > { %539 = vmatpush1.bf16.msra.mxu0 %v787_v55  ;;  %757 = vmatpush1.bf16.msra.mxu1 %v787_v55 }
  0x28   : > { %540 = vmatprep.subr.bf16.mxu0 %v799_v1  ;;  %746 = vmatprep.subr.bf16.mxu1 %v799_v1 }
  0x2b   : > { %541 = vmatpush1.bf16.msra.mxu0 %v788_v62  ;;  %758 = vmatpush1.bf16.msra.mxu1 %v788_v62 }
  0x2c   : > { %542 = vmatprep.subr.bf16.mxu0 %v799_v1  ;;  %747 = vmatprep.subr.bf16.mxu1 %v799_v1 }
  0x2f   : > { %543 = vmatpush1.bf16.msra.mxu0 %v789_v0  ;;  %759 = vmatpush1.bf16.msra.mxu1 %v789_v0 }
  0x30   : > { %544 = vmatprep.subr.bf16.mxu0 %v799_v1  ;;  %748 = vmatprep.subr.bf16.mxu1 %v799_v1  ;;  %v274_v1 = vrot.slane %v272_v33, 7  ;;  %v263_v33 = vor.u32 %v261_v36, %v260_v31 }
  0x32   : > { %v277_v6 = vor.u32 %v275_v18, %v274_v1  ;;  %v306_v37 = vsel %vm1015_vm6, 0, %v263_v33 }
  0x33   : > { %545 = vmatpush1.bf16.msra.mxu0 %v790_v2  ;;  %760 = vmatpush1.bf16.msra.mxu1 %v790_v2 }
  0x34   : > { %v308_v25 = vsel %vm1015_vm6, 0, %v277_v6 }
  0x83   : > { %v347_v7 = vpop.permute.xlu0 %346  ;;  %v349_v15 = vpop.permute.xlu1 %348 }
  0x84   : > { %v365_v11 = vsel %vm362_vm3, %v303_v5, %v347_v7  ;;  %v369_v22 = vsel %vm362_vm3, %v304_v19, %v349_v15 }
  0x85   : > { %555 = vmatmul.mubr.bf16.vlgmr.msra.gmra.mrb[0].mxu0 %v365_v11 }
  0x86   : > { %726 = vmatprep.mubr.msk.bf16.mxu0 %vm362_vm3, %v339_v43 }
  0x87   : > { %v355_v17 = vpop.permute.xlu0 %354  ;;  %v357_v24 = vpop.permute.xlu1 %356 }
  0x88   : > { %v381_v21 = vsel %vm362_vm3, %v307_v12, %v355_v17  ;;  %v385_v8 = vsel %vm362_vm3, %v308_v25, %v357_v24 }
  0x89   : > { %587 = vmatmul.mubr.bf16.vlgmr.msra.gmra.mrb[0].mxu1 %v381_v21 }
  0x8a   : > { %730 = vmatprep.mubr.msk.bf16.mxu1 %vm362_vm3, %v343_v47 }
  0x8b   : > { %v351_v18 = vpop.permute.xlu0 %350  ;;  %v359_v23 = vpop.permute.xlu1 %358 }
  0x8c   : > { %v373_v9 = vsel %vm362_vm3, %v305_v29, %v351_v18  ;;  %v389_v34 = vsel %vm362_vm3, %v309_v32, %v359_v23 }
  0x8d   : > { %563 = vmatmul.mubr.bf16.gmra.mrb[4].mxu0 %v369_v22 }
  0x8e   : > { %727 = vmatprep.mubr.msk.bf16.mxu0 %vm362_vm3, %v340_v51 }
  0x8f   : > { %v353_v35 = vpop.permute.xlu0 %352  ;;  %v361_v36 = vpop.permute.xlu1 %360 }
  0x90   : > { %v377_v16 = vsel %vm362_vm3, %v306_v37, %v353_v35  ;;  %v393_v40 = vsel %vm362_vm3, %v310_v39, %v361_v36 }
  0x91   : > { %595 = vmatmul.mubr.bf16.gmra.mrb[4].mxu1 %v385_v8 }
  0x92   : > { %731 = vmatprep.mubr.msk.bf16.mxu1 %vm362_vm3, %v344_v59 }
  0x95   : > { %571 = vmatmul.mubr.bf16.gmra.mrb[8].mxu0 %v373_v9 }
  0x96   : > { %728 = vmatprep.mubr.msk.bf16.mxu0 %vm362_vm3, %v341_v60 }
  0x99   : > { %603 = vmatmul.mubr.bf16.gmra.mrb[8].mxu1 %v389_v34 }
  0x9a   : > { %732 = vmatprep.mubr.msk.bf16.mxu1 %vm362_vm3, %v345_v63 }
  0x9d   : > { %579 = vmatmul.mubr.bf16.gmra.mrb[12].mxu0 %v377_v16 }
  0xa1   : > { %611 = vmatmul.mubr.bf16.gmra.mrb[12].mxu1 %v393_v40 }
 0x158   : > { %v556_v26 = vpop.f32.mrb[0].mxu0 }
 0x159   : > { %v557_v41 = vadd.f32 %v1081_v20, %v556_v26  ;;  %v558_v42 = vpop.f32.mrb[1].mxu0 }
 0x15a   : > { %v559_v43 = vpop.f32.mrb[2].mxu0 }
 0x15b   : > { %619 = vst [vmem:[%s1086_s24] sm:$0xff] %v557_v41  ;;  %v560_v44 = vadd.f32 %v1081_v20, %v559_v43  ;;  %v561_v45 = vpop.f32.mrb[3].mxu0 }
 0x15c   : > { %v588_v46 = vpop.f32.mrb[0].mxu1 }
 0x15d   : > { %620 = vst [vmem:[%s1086_s24 + $0x8] sm:$0xff] %v560_v44  ;;  %v589_v47 = vadd.f32 %v1081_v20, %v588_v46  ;;  %v590_v48 = vpop.f32.mrb[1].mxu1 }
 0x15e   : > { %v591_v49 = vpop.f32.mrb[2].mxu1 }
 0x15f   : > { %627 = vst [vmem:[%s1086_s24 + $0x40] sm:$0xff] %v589_v47  ;;  %v592_v50 = vadd.f32 %v1081_v20, %v591_v49  ;;  %v593_v51 = vpop.f32.mrb[3].mxu1 }
 0x160   : > { %v564_v52 = vpop.f32.mrb[4].mxu0 }
 0x161   : > { %628 = vst [vmem:[%s1086_s24 + $0x48] sm:$0xff] %v592_v50  ;;  %v565_v53 = vadd.f32 %v1081_v20, %v564_v52  ;;  %v566_v54 = vpop.f32.mrb[5].mxu0 }
 0x162   : > { %v567_v55 = vpop.f32.mrb[6].mxu0 }
 0x163   : > { %621 = vst [vmem:[%s1086_s24 + $0x10] sm:$0xff] %v565_v53  ;;  %v568_v56 = vadd.f32 %v1081_v20, %v567_v55  ;;  %v569_v57 = vpop.f32.mrb[7].mxu0 }
 0x164   : > { %v596_v58 = vpop.f32.mrb[4].mxu1 }
 0x165   : > { %622 = vst [vmem:[%s1086_s24 + $0x18] sm:$0xff] %v568_v56  ;;  %v597_v59 = vadd.f32 %v1081_v20, %v596_v58  ;;  %v598_v60 = vpop.f32.mrb[5].mxu1 }
 0x166   : > { %v599_v61 = vpop.f32.mrb[6].mxu1 }
 0x167   : > { %629 = vst [vmem:[%s1086_s24 + $0x50] sm:$0xff] %v597_v59  ;;  %v600_v62 = vadd.f32 %v1081_v20, %v599_v61  ;;  %v601_v63 = vpop.f32.mrb[7].mxu1 }
 0x168   : > { %v572_v0 = vpop.f32.mrb[8].mxu0 }
 0x169   : > { %630 = vst [vmem:[%s1086_s24 + $0x58] sm:$0xff] %v600_v62  ;;  %v573_v2 = vadd.f32 %v1081_v20, %v572_v0  ;;  %v574_v3 = vpop.f32.mrb[9].mxu0 }
 0x16a   : > { %v575_v4 = vpop.f32.mrb[10].mxu0 }
 0x16b   : > { %623 = vst [vmem:[%s1086_s24 + $0x20] sm:$0xff] %v573_v2  ;;  %v576_v5 = vadd.f32 %v1081_v20, %v575_v4  ;;  %v577_v7 = vpop.f32.mrb[11].mxu0 }
 0x16c   : > { %v604_v10 = vpop.f32.mrb[8].mxu1 }
 0x16d   : > { %624 = vst [vmem:[%s1086_s24 + $0x28] sm:$0xff] %v576_v5  ;;  %v605_v1 = vadd.f32 %v1081_v20, %v604_v10  ;;  %v606_v11 = vpop.f32.mrb[9].mxu1 }
 0x16e   : > { %v607_v12 = vpop.f32.mrb[10].mxu1 }
 0x16f   : > { %631 = vst [vmem:[%s1086_s24 + $0x60] sm:$0xff] %v605_v1  ;;  %v608_v15 = vadd.f32 %v1081_v20, %v607_v12  ;;  %v609_v17 = vpop.f32.mrb[11].mxu1 }
 0x170   : > { %v580_v19 = vpop.f32.mrb[12].mxu0 }
 0x171   : > { %632 = vst [vmem:[%s1086_s24 + $0x68] sm:$0xff] %v608_v15  ;;  %v581_v6 = vadd.f32 %v1081_v20, %v580_v19  ;;  %v582_v14 = vpop.f32.mrb[13].mxu0 }
 0x172   : > { %v583_v21 = vpop.f32.mrb[14].mxu0 }
 0x173   : > { %625 = vst [vmem:[%s1086_s24 + $0x30] sm:$0xff] %v581_v6  ;;  %v584_v22 = vadd.f32 %v1081_v20, %v583_v21  ;;  %v585_v24 = vpop.f32.mrb[15].mxu0 }
 0x174   : > { %v612_v25 = vpop.f32.mrb[12].mxu1 }
 0x175   : > { %626 = vst [vmem:[%s1086_s24 + $0x38] sm:$0xff] %v584_v22  ;;  %v613_v27 = vadd.f32 %v1081_v20, %v612_v25  ;;  %v614_v28 = vpop.f32.mrb[13].mxu1 }
 0x176   : > { %v615_v8 = vpop.f32.mrb[14].mxu1 }
 0x177   : > { %633 = vst [vmem:[%s1086_s24 + $0x70] sm:$0xff] %v613_v27  ;;  %v616_v18 = vadd.f32 %v1081_v20, %v615_v8  ;;  %v617_v29 = vpop.f32.mrb[15].mxu1 }
 0x179   : > { %634 = vst [vmem:[%s1086_s24 + $0x78] sm:$0xff] %v616_v18 }
 0x17a PF: > { %s13_s12 = sadd.s32 1, %s797_s12  }
 0x17b   : > { %p10_p4 = scmp.ge.s32.totalorder %s13_s12, 4  }
 0x17d   :  { %12 = sbr.rel (!%p10_p4) target bundleno = 1 (0x1), region = 62 }

</bundles_post_ra>
